<compile_context>
chip_gen: v7x
topology: tpu7x:2x2x1
jax: 0.10.0
libtpu: 0.0.40
codegen_flags: <defaults>
</compile_context>

<pallas_src>
import jax
import jax.numpy as jnp
from jax.experimental import pallas as pl
from jax.experimental.pallas import tpu as pltpu

IGNORE_INDEX = -1
_LANES = 128
_SUBLANES = 8
_SUPER = _LANES * _SUBLANES  # 1024 pixels per "super row"


def _focal_partials_kernel(x_ref, t_ref, loss_ref, cnt_ref):
    """Per-tile partial sums of cross-entropy and valid-pixel count.

    x_ref:    (C, rows, 128) logits (any float dtype)
    t_ref:    (rows, 128)    int32 targets (-1 = ignore)
    loss_ref: (8, 128)       f32 partial sum of per-pixel CE
    cnt_ref:  (8, 128)       f32 partial count of valid pixels
    """
    C = x_ref.shape[0]
    rows = t_ref.shape[0]

    tgt = t_ref[...]                              # (rows, 128) int32
    valid = tgt != IGNORE_INDEX                   # (rows, 128) bool

    def cls_logit(c):
        return x_ref[c].astype(jnp.float32)       # (rows, 128), re-read from VMEM (cheap)

    # numerically-stable log-sum-exp over classes (C is small & static -> unrolled,
    # all work fully lane+sublane dense on the VPU/EUP)
    m = cls_logit(0)
    for c in range(1, C):
        m = jnp.maximum(m, cls_logit(c))

    sumexp = jnp.zeros_like(m)
    picked = jnp.zeros_like(m)
    for c in range(C):
        lc = cls_logit(c)
        sumexp = sumexp + jnp.exp(lc - m)
        picked = picked + jnp.where(tgt == c, lc, 0.0)   # one-hot gather of target logit

    lse = m + jnp.log(sumexp)                      # (rows, 128)
    pix_loss = jnp.where(valid, lse - picked, 0.0)  # 0 for ignored / padded pixels
    pix_cnt = valid.astype(jnp.float32)

    # fold rows -> (8, 128) lane-dense partials (pure vreg adds, no XLU, no scalar RMW)
    acc_l = pix_loss[0:_SUBLANES]
    acc_c = pix_cnt[0:_SUBLANES]
    for j in range(1, rows // _SUBLANES):
        acc_l = acc_l + pix_loss[j * _SUBLANES:(j + 1) * _SUBLANES]
        acc_c = acc_c + pix_cnt[j * _SUBLANES:(j + 1) * _SUBLANES]
    loss_ref[...] = acc_l
    cnt_ref[...] = acc_c


def focal_loss(inputs, targets, alpha=1.0, gamma=2, target_block_bytes=1 << 20):
    """inputs: (N, C, H, W) float logits (f32 or bf16); targets: (N, H, W) ints (-1 = ignore)."""
    N, C, H, W = inputs.shape
    P = H * W

    x = inputs.reshape(N, C, P)                    # free reshape, native NCHW (no transpose)
    t = targets.reshape(N, P).astype(jnp.int32)

    # pad pixel axis to a multiple of 1024 (8 sublanes x 128 lanes); padded pixels get
    # ignore_index so they contribute nothing.
    P_pad = -(-P // _SUPER) * _SUPER
    if P_pad != P:
        x = jnp.pad(x, ((0, 0), (0, 0), (0, P_pad - P)))
        t = jnp.pad(t, ((0, 0), (0, P_pad - P)), constant_values=IGNORE_INDEX)

    n_super = P_pad // _SUPER
    # super-rows (1024 px) per tile: aim at ~target_block_bytes of logits per block,
    # capped at 64, and must divide n_super so no second padding pass is needed.
    itemsize = jnp.dtype(inputs.dtype).itemsize
    s_max = max(1, min(64, n_super, target_block_bytes // (C * _SUPER * itemsize)))
    s = 1
    for cand in range(s_max, 0, -1):
        if n_super % cand == 0:
            s = cand
            break
    T = n_super // s
    rows = s * _SUBLANES                  # sublane-rows per tile (multiple of 8)
    R = P_pad // _LANES                   # total sublane-rows

    x4 = x.reshape(N, C, R, _LANES)       # pixels on lanes, classes on a leading dim
    t3 = t.reshape(N, R, _LANES)

    loss_part, cnt_part = pl.pallas_call(
        _focal_partials_kernel,
        out_shape=(
            jax.ShapeDtypeStruct((N, T, _SUBLANES, _LANES), jnp.float32),
            jax.ShapeDtypeStruct((N, T, _SUBLANES, _LANES), jnp.float32),
        ),
        grid_spec=pltpu.PrefetchScalarGridSpec(
            num_scalar_prefetch=0,
            grid=(N, T),
            in_specs=[
                pl.BlockSpec((None, C, rows, _LANES), lambda b, i: (b, 0, i, 0)),
                pl.BlockSpec((None, rows, _LANES), lambda b, i: (b, i, 0)),
            ],
            out_specs=(
                pl.BlockSpec((None, None, _SUBLANES, _LANES),
                             lambda b, i: (b, i, 0, 0)),
                pl.BlockSpec((None, None, _SUBLANES, _LANES),
                             lambda b, i: (b, i, 0, 0)),
            ),
        ),
        compiler_params=pltpu.CompilerParams(
            dimension_semantics=("parallel", "parallel"),   # v7x: both TensorCores
            vmem_limit_bytes=32 * 1024 * 1024,              # explicit, with headroom on v7x
        ),
    )(x4, t3)

    # tiny final reduction + focal transform in plain JAX.
    # NOTE: if every pixel is ignore_index this is NaN, same as PyTorch CrossEntropyLoss.
    ce = jnp.sum(loss_part) / jnp.sum(cnt_part)
    pt = jnp.exp(-ce)
    return alpha * (1.0 - pt) ** gamma * ce


def _reference_focal_loss(inputs, targets, alpha=1.0, gamma=2):
    """Pure-JAX reference matching PyTorch FocalLoss.forward."""
    N, C, H, W = inputs.shape
    x = jnp.transpose(inputs, (0, 2, 3, 1)).reshape(-1, C).astype(jnp.float32)
    t = targets.reshape(-1)
    valid = t != IGNORE_INDEX
    logp = jax.nn.log_softmax(x, axis=-1)
    safe_t = jnp.where(valid, t, 0)
    picked = jnp.take_along_axis(logp, safe_t[:, None], axis=1)[:, 0]
    ce = jnp.sum(jnp.where(valid, -picked, 0.0)) / jnp.sum(valid.astype(jnp.float32))
    pt = jnp.exp(-ce)
    return alpha * (1.0 - pt) ** gamma * ce


if __name__ == "__main__":
    key = jax.random.PRNGKey(0)
    k1, k2, k3 = jax.random.split(key, 3)

    N, C, H, W = 2, 4, 16, 16
    inputs = jax.random.normal(k1, (N, C, H, W), dtype=jnp.float32)
    targets = jax.random.randint(k2, (N, H, W), 0, C, dtype=jnp.int32)
    # sprinkle some ignore_index=-1 pixels
    ignore_mask = jax.random.uniform(k3, (N, H, W)) < 0.1
    targets = jnp.where(ignore_mask, IGNORE_INDEX, targets)

    loss = focal_loss(inputs, targets, alpha=1.0, gamma=2)
    loss = jax.block_until_ready(loss)

    ref = _reference_focal_loss(inputs, targets, alpha=1.0, gamma=2)
    assert jnp.allclose(loss, ref, rtol=1e-5, atol=1e-6), (loss, ref)

    print("KERNEL_OK")
</pallas_src>

<mosaic_0001>
module attributes {stable_mosaic.version = 11 : i64} {
  func.func @_focal_partials_kernel(%arg0: i32, %arg1: i32, %arg2: memref<1x4x8x128xf32, #tpu.memory_space<vmem>>, %arg3: memref<1x8x128xi32, #tpu.memory_space<vmem>>, %arg4: memref<1x1x8x128xf32, #tpu.memory_space<vmem>>, %arg5: memref<1x1x8x128xf32, #tpu.memory_space<vmem>>) attributes {dimension_semantics = [#tpu.dimension_semantics<parallel>, #tpu.dimension_semantics<parallel>], iteration_bounds = array<i64: 2, 1>, scalar_prefetch = 0 : i64, scratch_operands = 0 : i64, tpu.core_type = #tpu.core_type<tc>, window_params = [{transform_indices = @transform_0, window_bounds = array<i64: 1, 4, 8, 128>}, {transform_indices = @transform_1, window_bounds = array<i64: 1, 8, 128>}, {transform_indices = @transform_2, window_bounds = array<i64: 1, 1, 8, 128>}, {transform_indices = @transform_3, window_bounds = array<i64: 1, 1, 8, 128>}]} {
    %c0 = arith.constant 0 : index
    %c0_0 = arith.constant 0 : index
    %c0_1 = arith.constant 0 : index
    %0 = vector.load %arg3[%c0, %c0_0, %c0_1] : memref<1x8x128xi32, #tpu.memory_space<vmem>>, vector<1x8x128xi32>
    %1 = vector.shape_cast %0 : vector<1x8x128xi32> to vector<8x128xi32>
    %c-1_i32 = arith.constant -1 : i32
    %2 = vector.broadcast %c-1_i32 : i32 to vector<8x128xi32>
    %3 = arith.cmpi ne, %1, %2 : vector<8x128xi32>
    %c0_2 = arith.constant 0 : index
    %c0_3 = arith.constant 0 : index
    %c0_4 = arith.constant 0 : index
    %c0_5 = arith.constant 0 : index
    %4 = vector.load %arg2[%c0_2, %c0_3, %c0_4, %c0_5] : memref<1x4x8x128xf32, #tpu.memory_space<vmem>>, vector<1x1x8x128xf32>
    %5 = vector.shape_cast %4 : vector<1x1x8x128xf32> to vector<8x128xf32>
    %c0_6 = arith.constant 0 : index
    %c1 = arith.constant 1 : index
    %c0_7 = arith.constant 0 : index
    %c0_8 = arith.constant 0 : index
    %6 = vector.load %arg2[%c0_6, %c1, %c0_7, %c0_8] : memref<1x4x8x128xf32, #tpu.memory_space<vmem>>, vector<1x1x8x128xf32>
    %7 = vector.shape_cast %6 : vector<1x1x8x128xf32> to vector<8x128xf32>
    %8 = arith.maximumf %5, %7 : vector<8x128xf32>
    %c0_9 = arith.constant 0 : index
    %c2 = arith.constant 2 : index
    %c0_10 = arith.constant 0 : index
    %c0_11 = arith.constant 0 : index
    %9 = vector.load %arg2[%c0_9, %c2, %c0_10, %c0_11] : memref<1x4x8x128xf32, #tpu.memory_space<vmem>>, vector<1x1x8x128xf32>
    %10 = vector.shape_cast %9 : vector<1x1x8x128xf32> to vector<8x128xf32>
    %11 = arith.maximumf %8, %10 : vector<8x128xf32>
    %c0_12 = arith.constant 0 : index
    %c3 = arith.constant 3 : index
    %c0_13 = arith.constant 0 : index
    %c0_14 = arith.constant 0 : index
    %12 = vector.load %arg2[%c0_12, %c3, %c0_13, %c0_14] : memref<1x4x8x128xf32, #tpu.memory_space<vmem>>, vector<1x1x8x128xf32>
    %13 = vector.shape_cast %12 : vector<1x1x8x128xf32> to vector<8x128xf32>
    %14 = arith.maximumf %11, %13 : vector<8x128xf32>
    %cst = arith.constant 0.000000e+00 : f32
    %15 = vector.broadcast %cst : f32 to vector<8x128xf32>
    %cst_15 = arith.constant 0.000000e+00 : f32
    %16 = vector.broadcast %cst_15 : f32 to vector<8x128xf32>
    %c0_16 = arith.constant 0 : index
    %c0_17 = arith.constant 0 : index
    %c0_18 = arith.constant 0 : index
    %c0_19 = arith.constant 0 : index
    %17 = vector.load %arg2[%c0_16, %c0_17, %c0_18, %c0_19] : memref<1x4x8x128xf32, #tpu.memory_space<vmem>>, vector<1x1x8x128xf32>
    %18 = vector.shape_cast %17 : vector<1x1x8x128xf32> to vector<8x128xf32>
    %19 = arith.subf %18, %14 : vector<8x128xf32>
    %20 = math.exp %19 : vector<8x128xf32>
    %21 = arith.addf %15, %20 : vector<8x128xf32>
    %c0_i32 = arith.constant 0 : i32
    %22 = vector.broadcast %c0_i32 : i32 to vector<8x128xi32>
    %23 = arith.cmpi eq, %1, %22 : vector<8x128xi32>
    %cst_20 = arith.constant 0.000000e+00 : f32
    %24 = vector.broadcast %cst_20 : f32 to vector<8x128xf32>
    %25 = arith.select %23, %18, %24 : vector<8x128xi1>, vector<8x128xf32>
    %26 = arith.addf %16, %25 : vector<8x128xf32>
    %c0_21 = arith.constant 0 : index
    %c1_22 = arith.constant 1 : index
    %c0_23 = arith.constant 0 : index
    %c0_24 = arith.constant 0 : index
    %27 = vector.load %arg2[%c0_21, %c1_22, %c0_23, %c0_24] : memref<1x4x8x128xf32, #tpu.memory_space<vmem>>, vector<1x1x8x128xf32>
    %28 = vector.shape_cast %27 : vector<1x1x8x128xf32> to vector<8x128xf32>
    %29 = arith.subf %28, %14 : vector<8x128xf32>
    %30 = math.exp %29 : vector<8x128xf32>
    %31 = arith.addf %21, %30 : vector<8x128xf32>
    %c1_i32 = arith.constant 1 : i32
    %32 = vector.broadcast %c1_i32 : i32 to vector<8x128xi32>
    %33 = arith.cmpi eq, %1, %32 : vector<8x128xi32>
    %cst_25 = arith.constant 0.000000e+00 : f32
    %34 = vector.broadcast %cst_25 : f32 to vector<8x128xf32>
    %35 = arith.select %33, %28, %34 : vector<8x128xi1>, vector<8x128xf32>
    %36 = arith.addf %26, %35 : vector<8x128xf32>
    %c0_26 = arith.constant 0 : index
    %c2_27 = arith.constant 2 : index
    %c0_28 = arith.constant 0 : index
    %c0_29 = arith.constant 0 : index
    %37 = vector.load %arg2[%c0_26, %c2_27, %c0_28, %c0_29] : memref<1x4x8x128xf32, #tpu.memory_space<vmem>>, vector<1x1x8x128xf32>
    %38 = vector.shape_cast %37 : vector<1x1x8x128xf32> to vector<8x128xf32>
    %39 = arith.subf %38, %14 : vector<8x128xf32>
    %40 = math.exp %39 : vector<8x128xf32>
    %41 = arith.addf %31, %40 : vector<8x128xf32>
    %c2_i32 = arith.constant 2 : i32
    %42 = vector.broadcast %c2_i32 : i32 to vector<8x128xi32>
    %43 = arith.cmpi eq, %1, %42 : vector<8x128xi32>
    %cst_30 = arith.constant 0.000000e+00 : f32
    %44 = vector.broadcast %cst_30 : f32 to vector<8x128xf32>
    %45 = arith.select %43, %38, %44 : vector<8x128xi1>, vector<8x128xf32>
    %46 = arith.addf %36, %45 : vector<8x128xf32>
    %c0_31 = arith.constant 0 : index
    %c3_32 = arith.constant 3 : index
    %c0_33 = arith.constant 0 : index
    %c0_34 = arith.constant 0 : index
    %47 = vector.load %arg2[%c0_31, %c3_32, %c0_33, %c0_34] : memref<1x4x8x128xf32, #tpu.memory_space<vmem>>, vector<1x1x8x128xf32>
    %48 = vector.shape_cast %47 : vector<1x1x8x128xf32> to vector<8x128xf32>
    %49 = arith.subf %48, %14 : vector<8x128xf32>
    %50 = math.exp %49 : vector<8x128xf32>
    %51 = arith.addf %41, %50 : vector<8x128xf32>
    %c3_i32 = arith.constant 3 : i32
    %52 = vector.broadcast %c3_i32 : i32 to vector<8x128xi32>
    %53 = arith.cmpi eq, %1, %52 : vector<8x128xi32>
    %cst_35 = arith.constant 0.000000e+00 : f32
    %54 = vector.broadcast %cst_35 : f32 to vector<8x128xf32>
    %55 = arith.select %53, %48, %54 : vector<8x128xi1>, vector<8x128xf32>
    %56 = arith.addf %46, %55 : vector<8x128xf32>
    %57 = math.log %51 : vector<8x128xf32>
    %58 = arith.addf %14, %57 : vector<8x128xf32>
    %59 = arith.subf %58, %56 : vector<8x128xf32>
    %cst_36 = arith.constant 0.000000e+00 : f32
    %60 = vector.broadcast %cst_36 : f32 to vector<8x128xf32>
    %61 = arith.select %3, %59, %60 : vector<8x128xi1>, vector<8x128xf32>
    %62 = arith.extui %3 : vector<8x128xi1> to vector<8x128xi32>
    %63 = arith.sitofp %62 : vector<8x128xi32> to vector<8x128xf32>
    %c0_37 = arith.constant 0 : index
    %c0_38 = arith.constant 0 : index
    %c0_39 = arith.constant 0 : index
    %c0_40 = arith.constant 0 : index
    %64 = vector.load %arg4[%c0_37, %c0_38, %c0_39, %c0_40] : memref<1x1x8x128xf32, #tpu.memory_space<vmem>>, vector<1x1x8x128xf32>
    %65 = vector.shape_cast %64 : vector<1x1x8x128xf32> to vector<8x128xf32>
    %66 = vector.shape_cast %61 : vector<8x128xf32> to vector<1x1x8x128xf32>
    tpu.vector_store %arg4[%c0_37, %c0_38, %c0_39, %c0_40], %66 {strides = array<i32>} : memref<1x1x8x128xf32, #tpu.memory_space<vmem>>, vector<1x1x8x128xf32>,
    %c0_41 = arith.constant 0 : index
    %c0_42 = arith.constant 0 : index
    %c0_43 = arith.constant 0 : index
    %c0_44 = arith.constant 0 : index
    %67 = vector.load %arg5[%c0_41, %c0_42, %c0_43, %c0_44] : memref<1x1x8x128xf32, #tpu.memory_space<vmem>>, vector<1x1x8x128xf32>
    %68 = vector.shape_cast %67 : vector<1x1x8x128xf32> to vector<8x128xf32>
    %69 = vector.shape_cast %63 : vector<8x128xf32> to vector<1x1x8x128xf32>
    tpu.vector_store %arg5[%c0_41, %c0_42, %c0_43, %c0_44], %69 {strides = array<i32>} : memref<1x1x8x128xf32, #tpu.memory_space<vmem>>, vector<1x1x8x128xf32>,
    return
  }
  func.func @transform_0(%arg0: i32, %arg1: i32) -> (i32, i32, i32, i32) {
    %c0_i32 = arith.constant 0 : i32
    %c0_i32_0 = arith.constant 0 : i32
    %c0_i32_1 = arith.constant 0 : i32
    return %arg0, %c0_i32, %arg1, %c0_i32_0 : i32, i32, i32, i32
  }
  func.func @transform_1(%arg0: i32, %arg1: i32) -> (i32, i32, i32) {
    %c0_i32 = arith.constant 0 : i32
    %c0_i32_0 = arith.constant 0 : i32
    return %arg0, %arg1, %c0_i32 : i32, i32, i32
  }
  func.func @transform_2(%arg0: i32, %arg1: i32) -> (i32, i32, i32, i32) {
    %c0_i32 = arith.constant 0 : i32
    %c0_i32_0 = arith.constant 0 : i32
    %c0_i32_1 = arith.constant 0 : i32
    return %arg0, %arg1, %c0_i32, %c0_i32_0 : i32, i32, i32, i32
  }
  func.func @transform_3(%arg0: i32, %arg1: i32) -> (i32, i32, i32, i32) {
    %c0_i32 = arith.constant 0 : i32
    %c0_i32_0 = arith.constant 0 : i32
    %c0_i32_1 = arith.constant 0 : i32
    return %arg0, %arg1, %c0_i32, %c0_i32_0 : i32, i32, i32, i32
  }
}

</mosaic_0001>

<bundles_post_ra>
// kernel: tpu_custom_call.1
= control target key start
LH: loop header
LB: loop body
LE: loop exit
PB: predicated region body
PF: predicated region fallthrough
CT: control target
= control target key end

     0   :  { %9 = vsyncpa [#allocation3], 0  ;;  %s1073_s0 = inlined_call_operand.hbm [shape: f32[2,4,8,128], index: 0, kind: input, shape index: {}]   ;;  %s1074_s1 = inlined_call_operand.hbm [shape: s32[2,8,128], index: 1, kind: input, shape index: {}]   ;;  %s1075_s2 = inlined_call_operand.hbm [shape: f32[2,1,8,128], index: 2, kind: output, shape index: {0}]   ;;  %s1076_s3 = inlined_call_operand.hbm [shape: f32[2,1,8,128], index: 3, kind: output, shape index: {1}]  }
   0x1   :  { %11 = vsyncpa [#allocation3 + $0x1], 0 }
   0x2   :  { %12 = vsyncpa [#allocation6], 0 }
   0x3   :  { %14 = vsyncpa [#allocation6 + $0x1], 0 }
   0x4   :  { %15 = vsyncpa [#allocation4], 0 }
   0x5   :  { %17 = vsyncpa [#allocation4 + $0x1], 0 }
   0x6   :  { %18 = vsyncpa [#allocation9], 0 }
   0x7   :  { %20 = vsyncpa [#allocation9 + $0x1], 0  ;;  %s797_s12 = smov 0   ;;  %s799_s13 = smov 0  }
   0x8   :  { %s801_s14 = smov 0   ;;  %s803_s15 = smov 0  }
   0x9   :  { %s805_s16 = smov 0   ;;  %s807_s17 = smov 0  }
   0xa LB: > { %s480_s18 = sadd.s32 4294967295, %s768_s17   ;;  %s481_s19 = sadd.s32 4294967294, %s768_s17   ;;  %s768_s17 = sphi %s807_s17, %s26_s17   ;;  %s764_s16 = sphi %s805_s16, %s1095_s16   ;;  %s760_s15 = sphi %s803_s15, %s1094_s15   ;;  %s756_s14 = sphi %s801_s14, %s1093_s14   ;;  %s752_s13 = sphi %s799_s13, %s1092_s13   ;;  %s748_s12 = sphi %s797_s12, %s1091_s12  }
   0xb   : > { %s38_s20 = sadd.s32 1, %s764_s16  ;;  %s47_s21 = sadd.s32 1, %s756_s14 }
   0xc   : > { %p40_p0 = scmp.ge.s32.totalorder %s38_s20, 2  ;;  %p54_p1 = scmp.ne.s32.totalorder %s756_s14, %s752_s13 }
   0xd   : > { %p55_p2 = scmp.eq.s32.totalorder %s768_s17, 0  ;;  %p60_p3 = scmp.ne.s32.totalorder %s752_s13, %s748_s12 }
   0xe   : > { %s1097_s20 = smov (%p40_p0, %s38_s20), 0  ;;  %p61_p5 = scmp.eq.s32.totalorder %s480_s18, 0 }
   0xf   : > { %p838_p4 = por %p55_p2, %p54_p1  ;;  %s42_s23 = ssub.s32 %s764_s16, %s1097_s20 }
  0x10   : > { %p114_p6 = scmp.eq.s32.totalorder %s480_s18, 1  ;;  %p45_p7 = scmp.eq.s32.totalorder %s42_s23, 0 }
  0x11   : > { %p844_p8 = por %p61_p5, %p60_p3  ;;  %p120_p10 = scmp.eq.s32.totalorder %s481_s19, 1 }
  0x12   : > { %p848_p9 = por %p114_p6, %p54_p1  ;;  %p527_p13 = scmp.lt.s32.totalorder %s768_s17, 2 }
  0x13   : > { %s1080_s24 = scalar_select %p844_p8, 1, 0 }
  0x14   : > { %s1081_s25 = scalar_select %p848_p9, 1, 0 }
  0x15   : > { %s853_s26 = scalar_select %p45_p7, %s756_s14, %s47_s21  }
  0x16   : > { %p855_p11 = por %p120_p10, %p60_p3  ;;  %s862_s28 = sand.u32 1, %s756_s14  }
  0x17   : > { %s484_s29 = sshll.u32 %s862_s28, 5  ;;  %s504_s30 = sshll.u32 %s764_s16, 9 }
  0x18   : > { %s1082_s27 = scalar_select %p855_p11, 1, 0 }
  0x19   : > { %s869_s6 = scalar_lea.hbm %s1073_s0, %s504_s30  ;;  %s172_s7 = scalar_lea.vmem [#allocation2], %s484_s29 }
  0x1a   : > { %s180_s8 = sshll.u32 %s172_s7, 4  ;;  %p875_p0 = pnand %p527_p13, %p838_p4  ;;  %s871_s8 = int_to_ptr.vmem [resolvable:$true] %s180_s8 }
  0x1b   : > { %s169_s10 = scalar_lea.sflag [#allocation3], %s862_s28  ;;  %s590_s11 = scalar_lea.hbm %s869_s6, 512 }
  0x1c   : > { %p591_p2 = scmp.ne.s32.totalorder %s869_s6, %s590_s11  ;;  %p592_p3 = pneg %p875_p0 }
  0x1d   : > { %s595_s21 = scalar_lea.hbm %s1073_s0, 1024  ;;  %p596_p4 = scmp.lt.u32.totalorder %s869_s6, %s1073_s0 }
  0x1e   : > { %p593_p5 = pnand %p592_p3, %p591_p2  ;;  %p597_p7 = scmp.lt.u32.totalorder %s595_s21, %s590_s11 }
  0x1f   : > { %p599_p13 = scmp.lt.u32.totalorder %s590_s11, %s869_s6 }
  0x20   : > { %p594_p6 = pneg %p593_p5  ;;  %p598_p10 = por %p597_p7, %p596_p4 }
  0x22   : > { %p600_p12 = por %p599_p13, %p598_p10 }
  0x24   : > { %p601_p1 = pnand %p600_p12, %p594_p6 }
  0x26   : > { %604 = shalt.err (!%p601_p1)
}
  0x27   : > { %s605_s29 = scalar_lea.vmem %s871_s8, 512  ;;  %s770_s30 = smov [#allocation2]  }
  0x28   : > { %p606_p2 = scmp.ne.s32.totalorder %s871_s8, %s605_s29  ;;  %s610_s4 = sshll.u32 %s770_s30, 4  ;;  %s611_s4 = int_to_ptr.vmem [resolvable:$false] %s610_s4 }
  0x29   : > { %s612_s5 = scalar_lea.vmem %s611_s4, 1024  ;;  %p613_p9 = scmp.lt.s32.totalorder %s871_s8, %s611_s4 }
  0x2a   : > { %p608_p5 = pnand %p606_p2, %p592_p3  ;;  %p614_p4 = scmp.lt.s32.totalorder %s612_s5, %s605_s29 }
  0x2c   : > { %p609_p11 = pneg %p608_p5  ;;  %p615_p7 = por %p614_p4, %p613_p9 }
  0x2e   : > { %p616_p10 = pnand %p615_p7, %p609_p11 }
  0x30   : > { %619 = shalt.err (!%p616_p10)
}
  0x31   : > { %s771_s7 = smov 128   ;;  %s772_s11 = smov 8  }
  0x32   : > { %516 = dma.hbm_to_vmem [thread:$0]  (!%p875_p0), %s869_s6, 512, %s871_s8, %s169_s10, %s771_s7, %s771_s7, %s772_s11  }
  0x33   : > { %p207_p12 = scmp.lt.s32.totalorder %s768_s17, 3  ;;  %s487_s18 = sshll.u32 %s862_s28, 3 }
  0x34   : > { %s488_s19 = sshll.u32 %s764_s16, 7  ;;  %p1084_p9 = scmp.ge.s32.totalorder %s768_s17, 1 }
  0x35   : > { %s920_s29 = scalar_lea.hbm %s1074_s1, %s488_s19  ;;  %s194_s30 = scalar_lea.vmem [#allocation5], %s487_s18 }
  0x36   : > { %p913_p11 = pnand %p1084_p9, %p207_p12  ;;  %s202_s4 = sshll.u32 %s194_s30, 4  ;;  %s203_s4 = int_to_ptr.vmem [resolvable:$true] %s202_s4 }
  0x37   : > { %s191_s6 = scalar_lea.sflag [#allocation6], %s862_s28  ;;  %s620_s8 = scalar_lea.hbm %s920_s29, 128 }
  0x38   : > { %s1085_s21 = scalar_select %p913_p11, 1, 0 }
  0x39   : > { %p621_p1 = scmp.ne.s32.totalorder %s920_s29, %s620_s8  ;;  %s625_s7 = scalar_lea.hbm %s1074_s1, 256 }
  0x3a   : > { %p626_p2 = scmp.lt.u32.totalorder %s920_s29, %s1074_s1  ;;  %p627_p5 = scmp.lt.u32.totalorder %s625_s7, %s620_s8 }
  0x3b   : > { %p623_p6 = pnand %p621_p1, %p592_p3  ;;  %p629_p7 = scmp.lt.u32.totalorder %s620_s8, %s920_s29 }
  0x3c   : > { %p628_p4 = por %p627_p5, %p626_p2 }
  0x3d   : > { %p624_p13 = pneg %p623_p6 }
  0x3e   : > { %p630_p10 = por %p629_p7, %p628_p4 }
  0x40   : > { %p631_p12 = pnand %p630_p10, %p624_p13 }
  0x42   : > { %634 = shalt.err (!%p631_p12)
}
  0x43   : > { %s635_s28 = scalar_lea.vmem %s203_s4, 128  ;;  %s773_s18 = smov [#allocation5]  }
  0x44   : > { %p636_p9 = scmp.ne.s32.totalorder %s203_s4, %s635_s28  ;;  %s640_s22 = sshll.u32 %s773_s18, 4  ;;  %s641_s22 = int_to_ptr.vmem [resolvable:$false] %s640_s22 }
  0x45   : > { %s642_s23 = scalar_lea.vmem %s641_s22, 256  ;;  %p643_p8 = scmp.lt.s32.totalorder %s203_s4, %s641_s22 }
  0x46   : > { %p638_p1 = pnand %p636_p9, %p592_p3  ;;  %p644_p11 = scmp.lt.s32.totalorder %s642_s23, %s635_s28 }
  0x48   : > { %p639_p6 = pneg %p638_p1  ;;  %p645_p2 = por %p644_p11, %p643_p8 }
  0x4a   : > { %p646_p5 = pnand %p645_p2, %p639_p6 }
  0x4c   : > { %649 = shalt.err (!%p646_p5)
}
  0x4d   : > { %519 = dma.hbm_to_vmem [thread:$0]  (!%p875_p0), %s920_s29, 128, %s203_s4, %s191_s6  }
  0x4e   : > { %p1086_p13 = scmp.ne.s32.totalorder %s1085_s21, 0 }
  0x4f   : > { %s945_s30 = sand.u32 (!%p1086_p13), 1, %s752_s13   ;;  %p1087_p3 = scmp.ne.s32.totalorder (!%p1086_p13), %s1080_s24, 0 }
  0x50   : > { %211 = sbr.rel (%p1086_p13) target bundleno = 170 (0xaa), region = 28  ;;  %s490_s8 = sshll.u32 (!%p1086_p13), %s945_s30, 5 }
  0x51   : > { %s214_s10 = scalar_lea.sflag (!%p1086_p13), [#allocation3], %s945_s30  ;;  %s217_s5 = scalar_lea.vmem (!%p1086_p13), [#allocation2], %s490_s8 }
  0x57   : > { %731 = dma.done.wait (%p1087_p3), %s214_s10, 512  }
  0x58   : > { %733 = vsyncadd (%p1087_p3), %s214_s10, 4294966784  ;;  %s954_s9 = sshll.u32 %s945_s30, 3  ;;  %s223_s21 = scalar_lea.sflag [#allocation6], %s945_s30 }
  0x59   : > { %s226_s29 = scalar_lea.vmem [#allocation5], %s954_s9 }
  0x5a   : > { %735 = dma.done.wait (%p1087_p3), %s223_s21, 128  }
  0x5b   : > { %737 = vsyncadd (%p1087_p3), %s223_s21, 4294967168  ;;  %s258_s4 = scalar_lea.vmem [#allocation8], %s954_s9  ;;  %v963_v0 = vld [vmem:[%s226_s29] sm:$0xff]  ;;  %s500_s7 = sshll.u32 %s760_s15, 7  ;;  %v495_v4 = vld [vmem:[%s217_s5 + $0x10] sm:$0xff]  ;;  %v774_v7 = vmov 0.0  }
  0x5c   : > { %s342_s6 = sshll.u32 %s258_s4, 4  ;;  %v261_v1 = vld [vmem:[%s217_s5] sm:$0xff]  ;;  %v494_v2 = vld [vmem:[%s217_s5 + $0x8] sm:$0xff]  ;;  %vm260_vm0 = vcmp.ne.s32.totalorder %v963_v0, 4294967295  ;;  %v967_v5 = vld [vmem:[%s217_s5 + $0x18] sm:$0xff]  ;;  %s976_s19 = scalar_lea.hbm %s1076_s3, %s500_s7  ;;  %s969_s6 = int_to_ptr.vmem [resolvable:$true] %s342_s6 }
  0x5d   : > { %v264_v3 = vmax.f32 %v261_v1, %v494_v2  ;;  %v497_v8 = vsel %vm260_vm0, 1.0, %v774_v7  ;;  %s314_s28 = scalar_lea.sflag [#allocation9], %s945_s30  ;;  %s650_s18 = scalar_lea.vmem %s969_s6, 128 }
  0x5e   : > { %307 = vst [vmem:[%s258_s4] sm:$0xff] %v497_v8  ;;  %p651_p8 = scmp.ne.s32.totalorder %s969_s6, %s650_s18  ;;  %p1088_p0 = scmp.ne.s32.totalorder %s1081_s25, 0 }
  0x5f   : > { %v267_v6 = vmax.f32 %v264_v3, %v495_v4  ;;  %s775_s22 = smov [#allocation8]  }
  0x60   : > { %p652_p11 = pnand %p651_p8, %p1088_p0  ;;  %s654_s23 = sshll.u32 %s775_s22, 4  ;;  %s655_s23 = int_to_ptr.vmem [resolvable:$false] %s654_s23 }
  0x61   : > { %v981_v9 = vmax.f32 %v267_v6, %v967_v5  ;;  %s656_s8 = scalar_lea.vmem %s655_s23, 256  ;;  %p657_p7 = scmp.lt.s32.totalorder %s969_s6, %s655_s23 }
  0x62   : > { %p653_p4 = pneg %p652_p11  ;;  %p658_p10 = scmp.lt.s32.totalorder %s656_s8, %s650_s18 }
  0x64   : > { %p659_p12 = por %p658_p10, %p657_p7 }
  0x66   : > { %p660_p9 = pnand %p659_p12, %p653_p4 }
  0x68   : > { %663 = shalt.err (!%p660_p9)
}
  0x69   : > { %s664_s10 = scalar_lea.hbm %s976_s19, 128  ;;  %s668_s29 = scalar_lea.hbm %s1076_s3, 256 }
  0x6a   : > { %p665_p1 = scmp.ne.s32.totalorder %s976_s19, %s664_s10  ;;  %p669_p5 = scmp.lt.u32.totalorder %s976_s19, %s1076_s3 }
  0x6b   : > { %p670_p13 = scmp.lt.u32.totalorder %s668_s29, %s664_s10  ;;  %p672_p8 = scmp.lt.u32.totalorder %s664_s10, %s976_s19 }
  0x6c   : > { %p666_p6 = pnand %p665_p1, %p1088_p0 }
  0x6d   : > { %p671_p3 = por %p670_p13, %p669_p5 }
  0x6e   : > { %p667_p2 = pneg %p666_p6 }
  0x6f   : > { %p673_p11 = por %p672_p8, %p671_p3 }
  0x71   : > { %p674_p4 = pnand %p673_p11, %p667_p2 }
  0x73   : > { %677 = shalt.err (!%p674_p4)
}
  0x74   : > { %510 = dma.vmem_to_hbm [thread:$0]  (%p1088_p0), %s969_s6, 128, %s976_s19, %s314_s28   ;;  %v271_v10 = vsub.f32 %v261_v1, %v981_v9  ;;  %v278_v11 = vsub.f32 %v494_v2, %v981_v9  ;;  %v285_v12 = vsub.f32 %v495_v4, %v981_v9  ;;  %v292_v13 = vsub.f32 %v967_v5, %v981_v9 }
  0x75   : > { %vm275_vm1 = vcmp.eq.s32.totalorder %v963_v0, 0  ;;  %vm282_vm2 = vcmp.eq.s32.totalorder %v963_v0, 1  ;;  %vm289_vm3 = vcmp.eq.s32.totalorder %v963_v0, 2  ;;  %vm296_vm4 = vcmp.eq.s32.totalorder %v963_v0, 3  ;;  %s251_s6 = scalar_lea.vmem [#allocation7], %s954_s9  ;;  %s1024_s18 = scalar_lea.hbm %s1075_s2, %s500_s7 }
  0x76   : > { %v272_v14 = vmul.f32 1.442695, %v271_v10  ;;  %v279_v15 = vmul.f32 1.442695, %v278_v11  ;;  %v286_v16 = vmul.f32 1.442695, %v285_v12 }
  0x77   : > { %v293_v17 = vmul.f32 1.442695, %v292_v13  ;;  %v276_v25 = vsel %vm275_vm1, %v261_v1, 0.0  ;;  %v283_v26 = vsel %vm282_vm2, %v494_v2, 0.0  ;;  %v290_v28 = vsel %vm289_vm3, %v495_v4, 0.0  ;;  %s328_s11 = sshll.u32 %s251_s6, 4  ;;  %s1017_s11 = int_to_ptr.vmem [resolvable:$true] %s328_s11 }
  0x78   : > { %580 = vpow2.f32 %v272_v14  ;;  %v284_v27 = vadd.f32 %v283_v26, %v276_v25  ;;  %v297_v30 = vsel %vm296_vm4, %v967_v5, 0.0  ;;  %s309_s9 = scalar_lea.sflag [#allocation4], %s945_s30  ;;  %s678_s22 = scalar_lea.vmem %s1017_s11, 128 }
  0x79   : > { %582 = vpow2.f32 %v279_v15  ;;  %p679_p7 = scmp.ne.s32.totalorder %s1017_s11, %s678_s22  ;;  %s776_s23 = smov [#allocation7]  }
  0x7a   : > { %584 = vpow2.f32 %v286_v16  ;;  %v291_v29 = vadd.f32 %v290_v28, %v284_v27  ;;  %s682_s15 = sshll.u32 %s776_s23, 4  ;;  %s683_s15 = int_to_ptr.vmem [resolvable:$false] %s682_s15 }
  0x7b   : > { %586 = vpow2.f32 %v293_v17  ;;  %p680_p10 = pnand %p679_p7, %p1088_p0  ;;  %s684_s8 = scalar_lea.vmem %s683_s15, 256 }
  0x7c   : > { %v298_v32 = vadd.f32 %v297_v30, %v291_v29  ;;  %p685_p9 = scmp.lt.s32.totalorder %s1017_s11, %s683_s15  ;;  %p686_p1 = scmp.lt.s32.totalorder %s684_s8, %s678_s22 }
  0x7d   : > { %p681_p12 = pneg %p680_p10 }
  0x7e   : > { %p687_p6 = por %p686_p1, %p685_p9 }
  0x80   : > { %p688_p2 = pnand %p687_p6, %p681_p12 }
  0x82   : > { %v581_v18 = vpop.eup %580 }
  0x83   : > { %v583_v19 = vpop.eup %582 }
  0x84   : > { %v585_v20 = vpop.eup %584  ;;  %v281_v21 = vadd.f32 %v583_v19, %v581_v18 }
  0x85   : > { %v587_v22 = vpop.eup %586 }
  0x86   : > { %v288_v23 = vadd.f32 %v585_v20, %v281_v21 }
  0x88   : > { %v295_v24 = vadd.f32 %v587_v22, %v288_v23 }
  0x8a   : > { %588 = vlog2.f32 %v295_v24 }
  0x94   : > { %v589_v31 = vpop.eup %588 }
  0x95   : > { %v300_v33 = vmul.f32 0.6931472, %v589_v31 }
  0x97   : > { %v301_v34 = vadd.f32 %v300_v33, %v981_v9 }
  0x99   : > { %v302_v35 = vsub.f32 %v301_v34, %v298_v32 }
  0x9b   : > { %v303_v36 = vsel %vm260_vm0, %v302_v35, 0.0 }
  0x9c   : > { %306 = vst [vmem:[%s251_s6] sm:$0xff] %v303_v36 }
  0x9d   : > { %691 = shalt.err (!%p688_p2)
}
  0x9e   : > { %s692_s30 = scalar_lea.hbm %s1024_s18, 128  ;;  %s696_s5 = scalar_lea.hbm %s1075_s2, 256 }
  0x9f   : > { %p693_p5 = scmp.ne.s32.totalorder %s1024_s18, %s692_s30  ;;  %p697_p8 = scmp.lt.u32.totalorder %s1024_s18, %s1075_s2 }
  0xa0   : > { %p698_p11 = scmp.lt.u32.totalorder %s696_s5, %s692_s30  ;;  %p700_p7 = scmp.lt.u32.totalorder %s692_s30, %s1024_s18 }
  0xa1   : > { %p694_p13 = pnand %p693_p5, %p1088_p0 }
  0xa2   : > { %p699_p4 = por %p698_p11, %p697_p8 }
  0xa3   : > { %p695_p3 = pneg %p694_p13 }
  0xa4   : > { %p701_p10 = por %p700_p7, %p699_p4 }
  0xa6   : > { %p702_p12 = pnand %p701_p10, %p695_p3 }
  0xa8   : > { %705 = shalt.err (!%p702_p12)
}
  0xa9   : > { %509 = dma.vmem_to_hbm [thread:$0]  (%p1088_p0), %s1017_s11, 128, %s1024_s18, %s309_s9  }
  0xaa PF: > { %s354_s4 = sand.u32 1, %s748_s12   ;;  %p1089_p9 = scmp.ne.s32.totalorder %s1082_s27, 0 }
  0xab   : > { %p1090_p1 = scmp.ge.s32.totalorder %s768_s17, 2  ;;  %s355_s24 = scalar_lea.sflag [#allocation4], %s354_s4 }
  0xad   : > { %p521_p6 = pnand %p1090_p1, %p1089_p9 }
  0xaf   : > { %739 = dma.done.wait (!%p521_p6), %s355_s24, 128  }
  0xb0   : > { %741 = vsyncadd (!%p521_p6), %s355_s24, 4294967168  ;;  %s364_s6 = scalar_lea.sflag [#allocation9], %s354_s4 }
  0xb1   : > { %743 = dma.done.wait (!%p521_p6), %s364_s6, 128  }
  0xb2   : > { %745 = vsyncadd (!%p521_p6), %s364_s6, 4294967168  ;;  %s26_s17 = sadd.s32 1, %s768_s17   ;;  %s1091_s12 = smov %s752_s13 }
  0xb3   : > { %p23_p2 = scmp.ge.s32.totalorder %s26_s17, 4   ;;  %s1092_s13 = smov %s756_s14 }
  0xb4   : > { %s1093_s14 = smov %s853_s26  ;;  %s1094_s15 = smov %s764_s16 }
  0xb5   : > { %s1095_s16 = smov %s1097_s20  ;;  %25 = sbr.rel (!%p23_p2) target bundleno = 10 (0xa), region = 106 }
  0xbc   :  { %369 = vsyncpa [#allocation3], 1 }
  0xbd   :  { %371 = vsyncpa [#allocation3 + $0x1], 1 }
  0xbe   :  { %372 = vsyncpa [#allocation6], 1 }
  0xbf   :  { %374 = vsyncpa [#allocation6 + $0x1], 1 }
  0xc0   :  { %375 = vsyncpa [#allocation4], 1 }
  0xc1   :  { %377 = vsyncpa [#allocation4 + $0x1], 1 }
  0xc2   :  { %378 = vsyncpa [#allocation9], 1 }
  0xc3   :  { %380 = vsyncpa [#allocation9 + $0x1], 1 }

</bundles_post_ra>
